<compile_context>
chip_gen: v7x
topology: tpu7x:2x2x1
jax: 0.10.0
libtpu: 0.0.40
codegen_flags: <defaults>
</compile_context>

<pallas_src>
import functools

import jax
import jax.numpy as jnp
from jax.experimental import pallas as pl
from jax.experimental.pallas import tpu as pltpu


def _mixup_ce_kernel(pred_ref, lab_ref, lam_ref, out_ref, acc_ref, *,
                     n_valid, tile_b, steps_per_shard):
    # pred_ref: [TB, C] logits (VMEM), input dtype (f32 or bf16)
    # lab_ref : [TB, 2] int32 labels (VMEM), col 0 = y_a, col 1 = y_b
    # lam_ref : [1] float32 (SMEM)
    # out_ref : [1, 8, 128] float32 per-shard partial (VMEM, resident over steps)
    # acc_ref : [1] float32 (SMEM scratch) per-shard running sum
    shard = pl.program_id(0)
    step = pl.program_id(1)

    @pl.when(step == 0)
    def _():
        acc_ref[0] = jnp.float32(0.0)

    pred = pred_ref[...]                                   # [TB, C], input dtype
    tb, c = pred.shape
    lam = lam_ref[0]

    labels = lab_ref[...]                                  # [TB, 2] int32
    ya = labels[:, 0:1]                                    # [TB, 1]
    yb = labels[:, 1:2]                                    # [TB, 1]

    # Stable log-sum-exp per row; elementwise path in input dtype, sum in f32.
    row_max = jnp.max(pred, axis=-1, keepdims=True)                       # [TB,1]
    sumexp = jnp.sum(jnp.exp(pred - row_max).astype(jnp.float32),
                     axis=-1, keepdims=True)                              # [TB,1]
    lse = row_max.astype(jnp.float32) + jnp.log(sumexp)                   # [TB,1]

    # Masked reductions (no materialized weight mask / extra casts).
    class_ids = jax.lax.broadcasted_iota(jnp.int32, (tb, c), 1)           # [TB,C]
    zero = jnp.zeros((), pred.dtype)
    pa = jnp.sum(jnp.where(class_ids == ya, pred, zero),
                 axis=-1, keepdims=True).astype(jnp.float32)              # [TB,1]
    pb = jnp.sum(jnp.where(class_ids == yb, pred, zero),
                 axis=-1, keepdims=True).astype(jnp.float32)              # [TB,1]
    mixed_true = lam * pa + (1.0 - lam) * pb                              # [TB,1]

    # Mask rows past the true batch (ragged last tile / over-provisioned shard).
    # jnp.where (not multiply) so garbage rows cannot inject NaN/Inf.
    block_idx = shard * steps_per_shard + step
    row_ids = block_idx * tile_b + jax.lax.broadcasted_iota(jnp.int32, (tb, 1), 0)
    per_row = jnp.where(row_ids < n_valid, lse - mixed_true, 0.0)         # [TB,1]

    acc_ref[0] += jnp.sum(per_row)

    @pl.when(step == pl.num_programs(1) - 1)
    def _():
        out_ref[...] = jnp.full(out_ref.shape,
                                acc_ref[0] * jnp.float32(1.0 / n_valid),
                                dtype=jnp.float32)


def _cdiv(a, b):
    return (a + b - 1) // b


def mixup_loss(pred, y_a, y_b, lam, *, tile_budget_bytes=8 << 20):
    """pred: [B, C] float (f32 or bf16); y_a, y_b: [B] int; lam: scalar float."""
    b, c = pred.shape
    itemsize = jnp.dtype(pred.dtype).itemsize

    # Batch tile from the byte budget (~2-8 MiB pred tiles). Second-to-last block
    # dim must be a multiple of 8 or equal the full batch dim.
    rows_budget = max(8, tile_budget_bytes // max(1, c * itemsize))
    if rows_budget >= b:
        tile_b = b                              # single (or full-dim) row tile
    else:
        tile_b = max(8, (min(rows_budget, b) // 8) * 8)

    nblocks = _cdiv(b, tile_b)

    # Shard the block loop across TensorCores (2 on v7x; harmless elsewhere).
    n_shards = 2 if nblocks >= 2 else 1
    steps_per_shard = _cdiv(nblocks, n_shards)
    overshoot = n_shards * steps_per_shard > nblocks

    def block_map(s, j):
        idx = s * steps_per_shard + j
        if overshoot:
            idx = jnp.minimum(idx, nblocks - 1)   # clamp; masked in-kernel anyway
        return (idx, 0)

    # Inputs: no padding, no copies. Labels packed -> one narrow DMA per step.
    labels = jnp.stack(
        [y_a.astype(jnp.int32), y_b.astype(jnp.int32)], axis=1)           # [B, 2]
    lam1 = jnp.asarray(lam, jnp.float32).reshape(1)

    tile_bytes = tile_b * c * itemsize
    vmem_limit = int(min(48 * 1024 * 1024,
                         max(32 * 1024 * 1024, 3 * tile_bytes + (2 << 20))))

    kernel = functools.partial(
        _mixup_ce_kernel, n_valid=b, tile_b=tile_b,
        steps_per_shard=steps_per_shard)

    partials = pl.pallas_call(
        kernel,
        out_shape=jax.ShapeDtypeStruct((n_shards, 8, 128), jnp.float32),
        grid=(n_shards, steps_per_shard),
        in_specs=[
            pl.BlockSpec((tile_b, c), block_map),            # logits tile (VMEM)
            pl.BlockSpec((tile_b, 2), block_map),            # packed labels (VMEM)
            pl.BlockSpec(memory_space=pltpu.SMEM),           # lam (SMEM)
        ],
        out_specs=pl.BlockSpec((1, 8, 128), lambda s, j: (s, 0, 0)),
        scratch_shapes=[pltpu.SMEM((1,), jnp.float32)],      # per-shard running sum
        compiler_params=pltpu.CompilerParams(
            dimension_semantics=("parallel", "arbitrary"),
            vmem_limit_bytes=vmem_limit,
        ),
    )(pred, labels, lam1)

    return jnp.sum(partials[:, 0, 0])


def _reference(pred, y_a, y_b, lam):
    logp = jax.nn.log_softmax(pred.astype(jnp.float32), axis=-1)
    ce_a = -jnp.mean(jnp.take_along_axis(logp, y_a[:, None], axis=-1))
    ce_b = -jnp.mean(jnp.take_along_axis(logp, y_b[:, None], axis=-1))
    return lam * ce_a + (1.0 - lam) * ce_b


if __name__ == "__main__":
    key = jax.random.PRNGKey(0)
    k1, k2, k3 = jax.random.split(key, 3)

    B, C = 8, 32
    pred = jax.random.normal(k1, (B, C), dtype=jnp.float32)
    y_a = jax.random.randint(k2, (B,), 0, C, dtype=jnp.int32)
    y_b = jax.random.randint(k3, (B,), 0, C, dtype=jnp.int32)
    lam = 0.7

    loss = mixup_loss(pred, y_a, y_b, lam)
    jax.block_until_ready(loss)

    ref = _reference(pred, y_a, y_b, lam)
    assert jnp.allclose(loss, ref, rtol=1e-5, atol=1e-5), (loss, ref)

    print("KERNEL_OK")
</pallas_src>

<mosaic_0001>
module attributes {stable_mosaic.version = 11 : i64} {
  func.func @_mixup_ce_kernel(%arg0: i32, %arg1: i32, %arg2: memref<8x32xf32, #tpu.memory_space<vmem>>, %arg3: memref<8x2xi32, #tpu.memory_space<vmem>>, %arg4: memref<1xf32, #tpu.memory_space<smem>>, %arg5: memref<1x8x128xf32, #tpu.memory_space<vmem>>, %arg6: memref<1xf32, #tpu.memory_space<smem>>) attributes {dimension_semantics = [#tpu.dimension_semantics<parallel>, #tpu.dimension_semantics<arbitrary>], iteration_bounds = array<i64: 1, 1>, scalar_prefetch = 0 : i64, scratch_operands = 1 : i64, tpu.core_type = #tpu.core_type<tc>, window_params = [{transform_indices = @transform_0, window_bounds = array<i64: 8, 32>}, {transform_indices = @transform_1, window_bounds = array<i64: 8, 2>}, {transform_indices = @transform_2, window_bounds = array<i64: 1>}, {transform_indices = @transform_3, window_bounds = array<i64: 1, 8, 128>}]} {
    %c0_i32 = arith.constant 0 : i32
    %0 = arith.cmpi eq, %arg1, %c0_i32 : i32
    %1 = arith.extui %0 : i1 to i32
    %c0_i32_0 = arith.constant 0 : i32
    %2 = arith.cmpi ne, %1, %c0_i32_0 : i32
    scf.if %2 {
      %cst_18 = arith.constant 0.000000e+00 : f32
      %c0_19 = arith.constant 0 : index
      %57 = memref.load %arg6[%c0_19] : memref<1xf32, #tpu.memory_space<smem>>
      memref.store %cst_18, %arg6[%c0_19] : memref<1xf32, #tpu.memory_space<smem>>
    } else {
    }
    %c0 = arith.constant 0 : index
    %c0_1 = arith.constant 0 : index
    %3 = vector.load %arg2[%c0, %c0_1] : memref<8x32xf32, #tpu.memory_space<vmem>>, vector<8x32xf32>
    %c0_2 = arith.constant 0 : index
    %4 = memref.load %arg4[%c0_2] : memref<1xf32, #tpu.memory_space<smem>>
    %c0_3 = arith.constant 0 : index
    %c0_4 = arith.constant 0 : index
    %5 = vector.load %arg3[%c0_3, %c0_4] : memref<8x2xi32, #tpu.memory_space<vmem>>, vector<8x2xi32>
    %6 = vector.extract_strided_slice %5 {offsets = [0, 0], sizes = [8, 1], strides = [1, 1]} : vector<8x2xi32> to vector<8x1xi32>
    %7 = vector.extract_strided_slice %5 {offsets = [0, 1], sizes = [8, 1], strides = [1, 1]} : vector<8x2xi32> to vector<8x1xi32>
    %cst = arith.constant dense<0xFF800000> : vector<8xf32>
    %8 = vector.multi_reduction <maximumf>, %3, %cst [1] : vector<8x32xf32> to vector<8xf32>
    %9 = vector.shape_cast %8 : vector<8xf32> to vector<8x1xf32>
    %10 = vector.broadcast %9 : vector<8x1xf32> to vector<8x32xf32>
    %11 = arith.subf %3, %10 : vector<8x32xf32>
    %12 = math.exp %11 : vector<8x32xf32>
    %cst_5 = arith.constant dense<0.000000e+00> : vector<8xf32>
    %13 = vector.multi_reduction <add>, %12, %cst_5 [1] : vector<8x32xf32> to vector<8xf32>
    %14 = vector.shape_cast %13 : vector<8xf32> to vector<8x1xf32>
    %15 = math.log %14 : vector<8x1xf32>
    %16 = arith.addf %9, %15 : vector<8x1xf32>
    %17 = tpu.iota {dimensions = array<i32: 1>} : vector<8x32xi32>
    %18 = vector.broadcast %6 : vector<8x1xi32> to vector<8x32xi32>
    %19 = arith.cmpi eq, %17, %18 : vector<8x32xi32>
    %cst_6 = arith.constant 0.000000e+00 : f32
    %20 = vector.broadcast %cst_6 : f32 to vector<8x32xf32>
    %21 = arith.select %19, %3, %20 : vector<8x32xi1>, vector<8x32xf32>
    %cst_7 = arith.constant dense<0.000000e+00> : vector<8xf32>
    %22 = vector.multi_reduction <add>, %21, %cst_7 [1] : vector<8x32xf32> to vector<8xf32>
    %23 = vector.shape_cast %22 : vector<8xf32> to vector<8x1xf32>
    %24 = vector.broadcast %7 : vector<8x1xi32> to vector<8x32xi32>
    %25 = arith.cmpi eq, %17, %24 : vector<8x32xi32>
    %cst_8 = arith.constant 0.000000e+00 : f32
    %26 = vector.broadcast %cst_8 : f32 to vector<8x32xf32>
    %27 = arith.select %25, %3, %26 : vector<8x32xi1>, vector<8x32xf32>
    %cst_9 = arith.constant dense<0.000000e+00> : vector<8xf32>
    %28 = vector.multi_reduction <add>, %27, %cst_9 [1] : vector<8x32xf32> to vector<8xf32>
    %29 = vector.shape_cast %28 : vector<8xf32> to vector<8x1xf32>
    %30 = vector.broadcast %4 : f32 to vector<8x1xf32>
    %31 = arith.mulf %30, %23 : vector<8x1xf32>
    %cst_10 = arith.constant 1.000000e+00 : f32
    %32 = arith.subf %cst_10, %4 : f32
    %33 = vector.broadcast %32 : f32 to vector<8x1xf32>
    %34 = arith.mulf %33, %29 : vector<8x1xf32>
    %35 = arith.addf %31, %34 : vector<8x1xf32>
    %c1_i32 = arith.constant 1 : i32
    %36 = arith.muli %arg0, %c1_i32 : i32
    %37 = arith.addi %36, %arg1 : i32
    %c8_i32 = arith.constant 8 : i32
    %38 = arith.muli %37, %c8_i32 : i32
    %39 = tpu.iota {dimensions = array<i32: 0>} : vector<8x1xi32>
    %40 = vector.broadcast %38 : i32 to vector<8x1xi32>
    %41 = arith.addi %40, %39 : vector<8x1xi32>
    %c8_i32_11 = arith.constant 8 : i32
    %42 = vector.broadcast %c8_i32_11 : i32 to vector<8x1xi32>
    %43 = arith.cmpi slt, %41, %42 : vector<8x1xi32>
    %44 = arith.subf %16, %35 : vector<8x1xf32>
    %cst_12 = arith.constant 0.000000e+00 : f32
    %45 = vector.broadcast %cst_12 : f32 to vector<8x1xf32>
    %46 = arith.select %43, %44, %45 : vector<8x1xi1>, vector<8x1xf32>
    %c0_13 = arith.constant 0 : index
    %47 = memref.load %arg6[%c0_13] : memref<1xf32, #tpu.memory_space<smem>>
    %48 = vector.shape_cast %46 : vector<8x1xf32> to vector<1x8x1xf32>
    %cst_14 = arith.constant dense<0.000000e+00> : vector<1xf32>
    %49 = vector.multi_reduction <add>, %48, %cst_14 [1, 2] : vector<1x8x1xf32> to vector<1xf32>
    %50 = vector.shape_cast %49 : vector<1xf32> to vector<1x1x1xf32>
    %51 = vector.extract %50[0, 0, 0] : f32 from vector<1x1x1xf32>
    %52 = arith.addf %47, %51 : f32
    %c0_15 = arith.constant 0 : index
    %53 = memref.load %arg6[%c0_15] : memref<1xf32, #tpu.memory_space<smem>>
    memref.store %52, %arg6[%c0_15] : memref<1xf32, #tpu.memory_space<smem>>
    %c0_i32_16 = arith.constant 0 : i32
    %54 = arith.cmpi eq, %arg1, %c0_i32_16 : i32
    %55 = arith.extui %54 : i1 to i32
    %c0_i32_17 = arith.constant 0 : i32
    %56 = arith.cmpi ne, %55, %c0_i32_17 : i32
    scf.if %56 {
      %c0_18 = arith.constant 0 : index
      %57 = memref.load %arg6[%c0_18] : memref<1xf32, #tpu.memory_space<smem>>
      %cst_19 = arith.constant 1.250000e-01 : f32
      %58 = arith.mulf %57, %cst_19 : f32
      %59 = vector.broadcast %58 : f32 to vector<1x8x128xf32>
      %c0_20 = arith.constant 0 : index
      %c0_21 = arith.constant 0 : index
      %c0_22 = arith.constant 0 : index
      %60 = vector.load %arg5[%c0_20, %c0_21, %c0_22] : memref<1x8x128xf32, #tpu.memory_space<vmem>>, vector<1x8x128xf32>
      tpu.vector_store %arg5[%c0_20, %c0_21, %c0_22], %59 {strides = array<i32>} : memref<1x8x128xf32, #tpu.memory_space<vmem>>, vector<1x8x128xf32>,
    } else {
    }
    return
  }
  func.func @transform_0(%arg0: i32, %arg1: i32) -> (i32, i32) {
    %c1_i32 = arith.constant 1 : i32
    %0 = arith.muli %arg0, %c1_i32 : i32
    %1 = arith.addi %0, %arg1 : i32
    %c0_i32 = arith.constant 0 : i32
    %c0_i32_0 = arith.constant 0 : i32
    return %1, %c0_i32 : i32, i32
  }
  func.func @transform_1(%arg0: i32, %arg1: i32) -> (i32, i32) {
    %c1_i32 = arith.constant 1 : i32
    %0 = arith.muli %arg0, %c1_i32 : i32
    %1 = arith.addi %0, %arg1 : i32
    %c0_i32 = arith.constant 0 : i32
    %c0_i32_0 = arith.constant 0 : i32
    return %1, %c0_i32 : i32, i32
  }
  func.func @transform_2(%arg0: i32, %arg1: i32) -> i32 {
    %c0_i32 = arith.constant 0 : i32
    %c0_i32_0 = arith.constant 0 : i32
    return %c0_i32 : i32
  }
  func.func @transform_3(%arg0: i32, %arg1: i32) -> (i32, i32, i32) {
    %c0_i32 = arith.constant 0 : i32
    %c0_i32_0 = arith.constant 0 : i32
    %c0_i32_1 = arith.constant 0 : i32
    return %arg0, %c0_i32, %c0_i32_0 : i32, i32, i32
  }
}

</mosaic_0001>

<bundles_post_ra>
// kernel: tpu_custom_call.1
= control target key start
LH: loop header
LB: loop body
LE: loop exit
PB: predicated region body
PF: predicated region fallthrough
CT: control target
= control target key end

     0   :  { %vm59_vm0 = vcmask 261120   ;;  %v189_v2 = vmov 0   ;;  %v190_v4 = vmov 1   ;;  %s240_s0 = inlined_call_operand.vmem [shape: f32[8,32], index: 0, kind: input, shape index: {}]   ;;  %s241_s1 = inlined_call_operand.vmem [shape: s32[8,2], index: 1, kind: input, shape index: {}]   ;;  %s242_s2 = inlined_call_operand.<no memory space> [shape: f32[1], index: 2, kind: input, shape index: {}]   ;;  %s243_s3 = inlined_call_operand.hbm [shape: f32[1,8,128], index: 3, kind: output, shape index: {}]  }
   0x1   :  { %v56_v0 = vld [vmem:[%s240_s0] sm:$0xff]  ;;  %158 = vset.pattern.permute.xlu0 %v189_v2  ;;  %159 = vset.pattern.permute.xlu1 %v190_v4 }
   0x2   :  { %v60_v1 = vsel %vm59_vm0, %v56_v0, -inf  ;;  %v58_v3 = vld [vmem:[%s241_s1] sm:$0xff] }
   0x3   :  { %9 = vsyncpa [#allocation5], 0  ;;  %61 = vmax.xlane.f32.xlu0 %v60_v1  ;;  %83 = vperm.xlu1 %159, %v58_v3   ;;  %v72_v8 = vlaneseq  ;;  %s92_s16 = ssub.f32 1.0, %s242_s2  ;;  %v90_v20 = vstv %s242_s2  ;;  %vm106_vm3 = vcmask 7168   ;;  %s191_s2 = smov [#allocation4]  }
   0x4   :  { %s133_s19 = sshll.u32 %s191_s2, 4  ;;  %s134_s19 = int_to_ptr.vmem [resolvable:$true] %s133_s19 }
   0x5   :  { %v73_v9 = vand.u32 127, %v72_v8  ;;  %v93_v21 = vstv %s92_s16  ;;  %s165_s22 = scalar_lea.vmem %s134_s19, 128  ;;  %p170_p1 = scmp.lt.s32.totalorder %s134_s19, %s134_s19 }
   0x6   :  { %p166_p0 = scmp.ne.s32.totalorder %s134_s19, %s165_s22  ;;  %p171_p2 = scmp.lt.s32.totalorder %s165_s22, %s165_s22 }
   0x8   :  { %p172_p3 = por %p171_p2, %p170_p1 }
   0xa   :  { %p173_p4 = pnand %p172_p3, %p166_p0 }
  0x19   :  { %75 = vperm.xlu0 %158, %v58_v3  }
  0x1d   :  { %160 = vset.pattern.permute.xlu0 %v190_v4 }
  0x82   :  { %v84_v11 = vpop.permute.xlu1 %83 }
  0x83   :  { %vm85_vm2 = vcmp.eq.s32.totalorder %v73_v9, %v84_v11 }
  0x84   :  { %v86_v16 = vsel %vm85_vm2, %v56_v0, 0.0 }
  0x85   :  { %v87_v17 = vsel %vm59_vm0, %v86_v16, 0.0 }
  0x90   :  { %v62_v5 = vpop.xlane.xlu0 %61 }
  0x91   :  { %v63_v6 = vsub.f32 %v56_v0, %v62_v5 }
  0x93   :  { %v64_v7 = vmul.f32 1.442695, %v63_v6 }
  0x95   :  { %161 = vpow2.f32 %v64_v7 }
  0x98   :  { %v76_v10 = vpop.permute.xlu0 %75 }
  0x99   :  { %vm77_vm1 = vcmp.eq.s32.totalorder %v73_v9, %v76_v10 }
  0x9a   :  { %v78_v13 = vsel %vm77_vm1, %v56_v0, 0.0 }
  0x9b   :  { %v79_v15 = vsel %vm59_vm0, %v78_v13, 0.0 }
  0x9f   :  { %v162_v12 = vpop.eup %161 }
  0xa0   :  { %v66_v14 = vsel %vm59_vm0, %v162_v12, 0.0 }
  0xa1   :  { %67 = vadd.xlane.f32.xlu1 %v66_v14 }
  0xa5   :  { %80 = vadd.xlane.f32.xlu1 %v79_v15 }
  0xa9   :  { %88 = vadd.xlane.f32.xlu1 %v87_v17 }
 0x12e   :  { %v68_v18 = vpop.xlane.xlu1 %67 }
 0x12f   :  { %163 = vlog2.f32 %v68_v18 }
 0x132   :  { %v81_v19 = vpop.xlane.xlu1 %80 }
 0x133   :  { %v91_v23 = vmul.f32 %v90_v20, %v81_v19 }
 0x136   :  { %v89_v22 = vpop.xlane.xlu1 %88 }
 0x137   :  { %v94_v24 = vmul.f32 %v93_v21, %v89_v22 }
 0x139   :  { %v164_v25 = vpop.eup %163  ;;  %v95_v27 = vadd.f32 %v94_v24, %v91_v23 }
 0x13a   :  { %v70_v26 = vmul.f32 0.6931472, %v164_v25 }
 0x13c   :  { %v71_v28 = vadd.f32 %v70_v26, %v62_v5 }
 0x13e   :  { %v103_v29 = vsub.f32 %v71_v28, %v95_v27 }
 0x140   :  { %v107_v30 = vsel %vm106_vm3, %v103_v29, 0.0 }
 0x141   :  { %108 = vadd.xlane.f32.xlu0 %v107_v30 }
 0x1ce   :  { %v109_v31 = vpop.xlane.xlu0 %108 }
 0x1cf   :  { %v110_v32 = vrot.slane %v109_v31, 4 }
 0x1d1   :  { %v111_v33 = vadd.f32 %v110_v32, %v109_v31 }
 0x1d3   :  { %v112_v34 = vrot.slane %v111_v33, 2 }
 0x1d5   :  { %v113_v35 = vadd.f32 %v112_v34, %v111_v33 }
 0x1d7   :  { %v114_v36 = vrot.slane %v113_v35, 1 }
 0x1d9   :  { %v115_v37 = vadd.f32 %v114_v36, %v113_v35 }
 0x1db   :  { %153 = vpush %v115_v37 }
 0x20c   :  { %s154_s20 = spop %153 }
 0x20d   :  { %s124_s21 = smul.f32 0.125, %s154_s20 }
 0x20f   :  { %v125_v38 = vstv %s124_s21 }
 0x210   :  { %126 = vst [vmem:[#allocation4] sm:$0xff] %v125_v38 }
 0x211   :  { %176 = shalt.err (!%p173_p4)
}
 0x212   :  { %s177_s25 = scalar_lea.hbm %s243_s3, 128 }
 0x213   :  { %p178_p5 = scmp.ne.s32.totalorder %s243_s3, %s177_s25  ;;  %p181_p6 = scmp.lt.u32.totalorder %s177_s25, %s243_s3 }
 0x215   :  { %p183_p7 = pnand %p181_p6, %p178_p5 }
 0x217   :  { %186 = shalt.err (!%p183_p7)
}
 0x218   :  { %136 = dma.vmem_to_hbm [thread:$0]  %s134_s19, 128, %s243_s3, [#allocation5]  }
 0x219   :  { %187 = dma.done.wait [#allocation5], 128  }
 0x21a   :  { %188 = vsyncadd [#allocation5], 4294967168 }
 0x21b   :  { %140 = vsyncpa [#allocation5], 1 }

</bundles_post_ra>
